<compile_context>
chip_gen: v7x
topology: tpu7x:2x2x1
jax: 0.10.0
libtpu: 0.0.40
codegen_flags: <defaults>
</compile_context>

<pallas_src>
import functools

import jax
import jax.numpy as jnp
from jax.experimental import pallas as pl
from jax.experimental.pallas import tpu as pltpu

_FOLD_W = 512  # lane width of the per-row-block running-max scratch accumulator


def _round_up(v, m):
    return -(-v // m) * m


def _dtype_min(dtype):
    dtype = jnp.dtype(dtype)
    if jnp.issubdtype(dtype, jnp.floating):
        return float("-inf")
    return int(jnp.iinfo(dtype).min)


def _vmem_capacity_bytes():
    try:
        return int(pltpu.get_tpu_info().vmem_capacity_bytes)
    except Exception:
        return 64 * 1024 * 1024  # conservative (v7x-sized) fallback; safe everywhere


# ---------------------------------------------------------------------------
# Kernels
# ---------------------------------------------------------------------------
def _gmp_kernel_single(x_ref, o_ref):
    # One grid step owns whole rows: (R_TILE, L) -> (1, 1, R_TILE) lane-dense max.
    o_ref[...] = jnp.max(x_ref[...], axis=-1).reshape(o_ref.shape)


def _gmp_kernel_tiled(x_ref, o_ref, acc_ref, *, l_true, l_tile, num_l, fill):
    # grid = (num_r, num_l); L is the last ("arbitrary") axis.
    # acc_ref: (R_TILE, _FOLD_W) VMEM running max, re-initialized at k == 0 of every
    # row block.  o_ref is only written on the final L step (flash-attn style).
    k = pl.program_id(1)
    last = num_l - 1  # Python int (num_l passed statically)

    @pl.when(k == 0)
    def _init():
        acc_ref[...] = jnp.full(acc_ref.shape, fill, dtype=acc_ref.dtype)

    @pl.when(k != last)
    def _body():
        # Pure VPU: elementwise max over 512-lane groups, no cross-lane work.
        acc = acc_ref[...]
        for s in range(0, l_tile, _FOLD_W):
            acc = jnp.maximum(acc, x_ref[:, s:s + _FOLD_W])
        acc_ref[...] = acc

    @pl.when(k == last)
    def _final():
        base = last * l_tile          # static column offset of the final chunk
        valid = l_true - base         # static count of valid columns (>= 1)
        acc = acc_ref[...]
        for s in range(0, l_tile, _FOLD_W):
            n_valid = valid - s
            if n_valid <= 0:
                break                  # group entirely past L: skipped at trace time
            grp = x_ref[:, s:s + _FOLD_W]
            if n_valid < _FOLD_W:      # only the one straddling group pays the mask
                col = jax.lax.broadcasted_iota(jnp.int32, grp.shape, 1)
                grp = jnp.where(col < n_valid, grp, jnp.array(fill, grp.dtype))
            acc = jnp.maximum(acc, grp)
        # Cross-lane reduce + sublane->lane relayout happen once per row block.
        row_max = jnp.max(acc, axis=-1)               # (R_TILE,)
        o_ref[...] = row_max.reshape(o_ref.shape)     # lane-dense (1, 1, R_TILE)


# ---------------------------------------------------------------------------
# Tile selection
# ---------------------------------------------------------------------------
def _choose_tiles(nr, l, itemsize, target_bytes):
    """Pick (R_TILE, L_TILE). Prefer full rows (num_l == 1); else tile L."""
    row_bytes = max(_round_up(l, 128), 128) * itemsize  # padded VMEM bytes per row
    if 8 * row_bytes <= target_bytes:
        # Whole rows fit: single-step reduction per row block.
        l_tile = l
        rows_fit = max(8, (target_bytes // row_bytes) // 8 * 8)
        if nr <= 8:
            r_tile = nr
        else:
            # Cap at ceil(NR/2) rounded to 8 so the "parallel" axis has >= 2 blocks
            # (both v7x TensorCores get work).
            r_tile = min(rows_fit, _round_up(nr, 8), _round_up(pl.cdiv(nr, 2), 8))
            r_tile = max(r_tile, 8)
    else:
        # Very long rows: tile the reduction axis (multiple of _FOLD_W).
        if nr <= 8:
            r_tile = nr
        else:
            r_tile = min(256, _round_up(nr, 8), _round_up(pl.cdiv(nr, 2), 8))
            r_tile = max(r_tile, 8)
        per_row = max(r_tile, 8) * itemsize
        l_tile = (target_bytes // per_row) // _FOLD_W * _FOLD_W
        l_tile = max(_FOLD_W, min(l_tile, 128 * 1024))  # bound trace/unroll size
    return r_tile, l_tile


# ---------------------------------------------------------------------------
# Wrapper
# ---------------------------------------------------------------------------
def global_max_pool1d(x: jax.Array, *, tile_override=None) -> jax.Array:
    """Equivalent of torch.max_pool1d(x, kernel_size=x.shape[-1]): (N,C,L)->(N,C,1)."""
    N, C, L = x.shape
    NR = N * C
    xf = x.reshape(NR, L)  # contiguous, free
    itemsize = jnp.dtype(x.dtype).itemsize
    fill = _dtype_min(x.dtype)

    vmem_cap = _vmem_capacity_bytes()
    # Generation-aware per-buffer input target: 16 MiB on 128-MiB-VMEM chips
    # (v5e/v6e), 8 MiB on 64-MiB-VMEM chips (v7x).  Double-buffered by Pallas.
    target_bytes = (16 << 20) if vmem_cap >= (96 << 20) else (8 << 20)

    if tile_override is not None:
        R_TILE, L_TILE = tile_override
    else:
        R_TILE, L_TILE = _choose_tiles(NR, L, itemsize, target_bytes)

    single = L_TILE >= L
    if single:
        L_TILE = L
    else:
        assert L_TILE % _FOLD_W == 0, "tiled path requires L_TILE to be a multiple of 512"

    num_r = pl.cdiv(NR, R_TILE)
    num_l = 1 if single else pl.cdiv(L, L_TILE)

    # VMEM budget derived from the actual (padded) buffers, not a fixed constant.
    in_buf = _round_up(max(R_TILE, 8), 8) * _round_up(L_TILE, 128) * itemsize
    out_buf = 8 * _round_up(R_TILE, 128) * itemsize
    acc_buf = 0 if single else _round_up(max(R_TILE, 8), 8) * _FOLD_W * itemsize
    need = 2 * in_buf + 2 * out_buf + acc_buf
    vmem_limit = int(min(max(need + (4 << 20), 16 << 20), vmem_cap))

    cost = pl.CostEstimate(
        flops=NR * L,
        transcendentals=0,
        bytes_accessed=NR * L * itemsize + NR * itemsize,
    )

    if single:
        out = pl.pallas_call(
            _gmp_kernel_single,
            out_shape=jax.ShapeDtypeStruct((num_r, 1, R_TILE), x.dtype),
            grid_spec=pltpu.PrefetchScalarGridSpec(
                num_scalar_prefetch=0,
                grid=(num_r,),
                in_specs=[pl.BlockSpec((R_TILE, L), lambda r: (r, 0))],
                out_specs=pl.BlockSpec((1, 1, R_TILE), lambda r: (r, 0, 0)),
            ),
            compiler_params=pltpu.CompilerParams(
                dimension_semantics=("parallel",),
                vmem_limit_bytes=vmem_limit,
            ),
            cost_estimate=cost,
        )(xf)
    else:
        kernel = functools.partial(
            _gmp_kernel_tiled, l_true=L, l_tile=L_TILE, num_l=num_l, fill=fill)
        out = pl.pallas_call(
            kernel,
            out_shape=jax.ShapeDtypeStruct((num_r, 1, R_TILE), x.dtype),
            grid_spec=pltpu.PrefetchScalarGridSpec(
                num_scalar_prefetch=0,
                grid=(num_r, num_l),                        # reduction axis last
                in_specs=[pl.BlockSpec((R_TILE, L_TILE), lambda r, k: (r, k))],
                out_specs=pl.BlockSpec((1, 1, R_TILE), lambda r, k: (r, 0, 0)),
                scratch_shapes=[pltpu.VMEM((R_TILE, _FOLD_W), x.dtype)],
            ),
            compiler_params=pltpu.CompilerParams(
                dimension_semantics=("parallel", "arbitrary"),
                vmem_limit_bytes=vmem_limit,
            ),
            cost_estimate=cost,
        )(xf)

    # Drop padded rows of the partial last row block (their values are reductions
    # over undefined VMEM and are discarded here) and restore (N, C, 1).
    return out.reshape(num_r * R_TILE)[:NR].reshape(N, C, 1)


if __name__ == "__main__":
    key = jax.random.PRNGKey(0)
    k1, k2, k3 = jax.random.split(key, 3)

    # 1) Primary small case matching the module's (N, C, L) convention -> single path.
    N, C, L = 2, 4, 16
    x = jax.random.normal(k1, (N, C, L), dtype=jnp.float32)
    out = jax.block_until_ready(global_max_pool1d(x))
    ref = jnp.max(x, axis=-1, keepdims=True)
    assert out.shape == (N, C, 1), out.shape
    assert jnp.allclose(out, ref), "mismatch vs reference (primary case)"

    # 2) Tiled path: multiple row blocks (partial last) + partially-valid final group.
    N2, C2, L2 = 2, 5, 1000
    x2 = jax.random.normal(k2, (N2, C2, L2), dtype=jnp.float32)
    out2 = jax.block_until_ready(global_max_pool1d(x2, tile_override=(8, 512)))
    ref2 = jnp.max(x2, axis=-1, keepdims=True)
    assert out2.shape == (N2, C2, 1), out2.shape
    assert jnp.allclose(out2, ref2), "mismatch vs reference (tiled case)"

    # 3) Tiled path where the final step has a fully-skipped 512-lane group.
    N3, C3, L3 = 2, 4, 1100
    x3 = jax.random.normal(k3, (N3, C3, L3), dtype=jnp.float32)
    out3 = jax.block_until_ready(global_max_pool1d(x3, tile_override=(8, 1024)))
    ref3 = jnp.max(x3, axis=-1, keepdims=True)
    assert out3.shape == (N3, C3, 1), out3.shape
    assert jnp.allclose(out3, ref3), "mismatch vs reference (skip-group case)"

    print("KERNEL_OK")
</pallas_src>

<mosaic_0001>
module attributes {stable_mosaic.version = 11 : i64} {
  func.func @_gmp_kernel_single(%arg0: i32, %arg1: memref<8x16xf32, #tpu.memory_space<vmem>>, %arg2: memref<1x1x8xf32, #tpu.memory_space<vmem>>) attributes {dimension_semantics = [#tpu.dimension_semantics<parallel>], iteration_bounds = array<i64: 1>, scalar_prefetch = 0 : i64, scratch_operands = 0 : i64, tpu.core_type = #tpu.core_type<tc>, window_params = [{transform_indices = @transform_0, window_bounds = array<i64: 8, 16>}, {transform_indices = @transform_1, window_bounds = array<i64: 1, 1, 8>}]} {
    %c0 = arith.constant 0 : index
    %c0_0 = arith.constant 0 : index
    %0 = vector.load %arg1[%c0, %c0_0] : memref<8x16xf32, #tpu.memory_space<vmem>>, vector<8x16xf32>
    %cst = arith.constant dense<0xFF800000> : vector<8xf32>
    %1 = vector.multi_reduction <maximumf>, %0, %cst [1] : vector<8x16xf32> to vector<8xf32>
    %2 = vector.shape_cast %1 : vector<8xf32> to vector<1x1x8xf32>
    %c0_1 = arith.constant 0 : index
    %c0_2 = arith.constant 0 : index
    %c0_3 = arith.constant 0 : index
    %3 = vector.load %arg2[%c0_1, %c0_2, %c0_3] : memref<1x1x8xf32, #tpu.memory_space<vmem>>, vector<1x1x8xf32>
    tpu.vector_store %arg2[%c0_1, %c0_2, %c0_3], %2 {strides = array<i32>} : memref<1x1x8xf32, #tpu.memory_space<vmem>>, vector<1x1x8xf32>,
    return
  }
  func.func @transform_0(%arg0: i32) -> (i32, i32) {
    %c0_i32 = arith.constant 0 : i32
    %c0_i32_0 = arith.constant 0 : i32
    return %arg0, %c0_i32 : i32, i32
  }
  func.func @transform_1(%arg0: i32) -> (i32, i32, i32) {
    %c0_i32 = arith.constant 0 : i32
    %c0_i32_0 = arith.constant 0 : i32
    %c0_i32_1 = arith.constant 0 : i32
    return %arg0, %c0_i32, %c0_i32_0 : i32, i32, i32
  }
}

</mosaic_0001>

<bundles_post_ra>
// kernel: tpu_custom_call.1
= control target key start
LH: loop header
LB: loop body
LE: loop exit
PB: predicated region body
PF: predicated region fallthrough
CT: control target
= control target key end

     0   :  { %6 = vsyncpa [#allocation3], 0  ;;  %s137_s0 = inlined_call_operand.hbm [shape: f32[8,16], index: 0, kind: input, shape index: {}]   ;;  %s138_s1 = inlined_call_operand.hbm [shape: f32[1,1,8], index: 1, kind: output, shape index: {}]  }
   0x1   :  { %7 = vsyncpa [#allocation4], 0  ;;  %s101_s6 = smov [#allocation2]   ;;  %s53_s10 = scalar_lea.hbm %s137_s0, 128 }
   0x2   :  { %s14_s7 = sshll.u32 %s101_s6, 4  ;;  %p54_p0 = scmp.ne.s32.totalorder %s137_s0, %s53_s10  ;;  %s15_s7 = int_to_ptr.vmem [resolvable:$true] %s14_s7 }
   0x3   :  { %p57_p1 = scmp.lt.u32.totalorder %s53_s10, %s137_s0 }
   0x5   :  { %p59_p2 = pnand %p57_p1, %p54_p0 }
   0x7   :  { %62 = shalt.err (!%p59_p2)
}
   0x8   :  { %s63_s15 = scalar_lea.vmem %s15_s7, 128  ;;  %p68_p4 = scmp.lt.s32.totalorder %s15_s7, %s15_s7 }
   0x9   :  { %p64_p3 = scmp.ne.s32.totalorder %s15_s7, %s63_s15  ;;  %p69_p5 = scmp.lt.s32.totalorder %s63_s15, %s63_s15 }
   0xb   :  { %p70_p6 = por %p69_p5, %p68_p4 }
   0xd   :  { %p71_p7 = pnand %p70_p6, %p64_p3 }
   0xf   :  { %74 = shalt.err (!%p71_p7)
}
  0x10   :  { %17 = dma.hbm_to_vmem [thread:$0]  %s137_s0, 128, %s15_s7, [#allocation3]  }
  0x11   :  { %97 = dma.done.wait [#allocation3], 128  }
  0x12   :  { %98 = vsyncadd [#allocation3], 4294967168  ;;  %vm22_vm0 = vcmask 130048   ;;  %v21_v0 = vld [vmem:[#allocation2] sm:$0xff]  ;;  %v27_v2 = vlaneseq  ;;  %s102_s18 = smov [#allocation5]   ;;  %vm34_vm1 = vcmask 57344  }
  0x13   :  { %v23_v1 = vsel %vm22_vm0, %v21_v0, -inf  ;;  %s42_s19 = sshll.u32 %s102_s18, 4  ;;  %s43_s19 = int_to_ptr.vmem [resolvable:$true] %s42_s19 }
  0x14   :  { %24 = vmax.xlane.f32.xlu0 %v23_v1  ;;  %v28_v3 = vand.u32 127, %v27_v2  ;;  %v30_v4 = vshrl.u32 %v27_v2, 7  ;;  %s75_s20 = scalar_lea.vmem %s43_s19, 16  ;;  %s79_s0 = scalar_lea.vmem %s43_s19, 32 }
  0x15   :  { %p76_p8 = scmp.ne.s32.totalorder %s43_s19, %s75_s20  ;;  %p80_p9 = scmp.lt.s32.totalorder %s43_s19, %s43_s19 }
  0x16   :  { %v31_v5 = vsub.s32 %v28_v3, %v30_v4  ;;  %p81_p10 = scmp.lt.s32.totalorder %s79_s0, %s75_s20 }
  0x18   :  { %p82_p11 = por %p81_p10, %p80_p9 }
  0x1a   :  { %p83_p12 = pnand %p82_p11, %p76_p8 }
  0xa1   :  { %v25_v6 = vpop.xlane.xlu0 %24 }
  0xa2   :  { %v32_v7 = vrot.slane %v25_v6, %v31_v5 }
  0xa4   :  { %35 = vst.msk [vmem:[#allocation5] sm:$0x1] %vm34_vm1, %v32_v7 }
  0xa5   :  { %86 = shalt.err (!%p83_p12)
}
  0xa6   :  { %s87_s23 = scalar_lea.hbm %s138_s1, 16 }
  0xa7   :  { %p88_p13 = scmp.ne.s32.totalorder %s138_s1, %s87_s23  ;;  %p91_p0 = scmp.lt.u32.totalorder %s87_s23, %s138_s1 }
  0xa9   :  { %p93_p1 = pnand %p91_p0, %p88_p13 }
  0xab   :  { %96 = shalt.err (!%p93_p1)
}
  0xac   :  { %45 = dma.vmem_to_hbm [thread:$0]  %s43_s19, 16, %s138_s1, [#allocation4]  }
  0xad   :  { %99 = dma.done.wait [#allocation4], 16  }
  0xae   :  { %100 = vsyncadd [#allocation4], 4294967280 }
  0xaf   :  { %49 = vsyncpa [#allocation3], 1 }
  0xb0   :  { %50 = vsyncpa [#allocation4], 1 }

</bundles_post_ra>
